<compile_context>
chip_gen: v6e
topology: v6e:2x2x1
jax: 0.10.0
libtpu: 0.0.40
codegen_flags: <defaults>
</compile_context>

<pallas_src>
import functools

import jax
import jax.numpy as jnp
from jax.experimental import pallas as pl
from jax.experimental.pallas import tpu as pltpu

LN_EPS = 1e-5
_SUBLANE = 8   # f32 sublane tile


def _vmem_limit_bytes():
    # ~0.75 * physical VMEM: ~96 MiB on v5e/v6e (128 MiB), ~48 MiB on v7x (64 MiB).
    try:
        cap = pltpu.get_tpu_info().vmem_capacity_bytes
    except Exception:
        cap = 64 * 1024 * 1024
    return int(cap) * 3 // 4


def _layernorm_f32(y, g, beta):
    # PyTorch LayerNorm: biased variance, eps inside rsqrt.
    mean = jnp.mean(y, axis=-1, keepdims=True)
    diff = y - mean
    var = jnp.mean(diff * diff, axis=-1, keepdims=True)
    return diff * jax.lax.rsqrt(var + LN_EPS) * g + beta


def _token_kernel(x_ref, w_ref, b_ref, g_ref, beta_ref, o_ref):
    # One token per grid step:
    #   x_ref: (B_pad, K)  w_ref: (K, D)  b/g/beta: (1, D)  o_ref: (B_pad, D)
    y = jnp.dot(x_ref[...], w_ref[...], preferred_element_type=jnp.float32)
    y = y + b_ref[...].astype(jnp.float32)
    o_ref[...] = _layernorm_f32(
        y, g_ref[...].astype(jnp.float32), beta_ref[...].astype(jnp.float32)
    ).astype(o_ref.dtype)


def _fused_kernel(x_ref, w_ref, b_ref, g_ref, beta_ref, o_ref, *, tokens, cross_dim):
    # Fallback for cross_dim % 128 != 0: single grid step, full arrays in VMEM,
    # static per-token slices (may incur relayouts; only for non-standard dims).
    g = g_ref[...].astype(jnp.float32)
    beta = beta_ref[...].astype(jnp.float32)
    for t in range(tokens):               # static unroll
        lo, hi = t * cross_dim, (t + 1) * cross_dim
        y = jnp.dot(x_ref[...], w_ref[:, lo:hi], preferred_element_type=jnp.float32)
        y = y + b_ref[:, lo:hi].astype(jnp.float32)
        o_ref[:, lo:hi] = _layernorm_f32(y, g, beta).astype(o_ref.dtype)


def image_proj_model(image_embeds, w, b, gamma, beta, *,
                     clip_extra_context_tokens, cross_attention_dim,
                     param_dtype=jnp.bfloat16):
    """image_embeds: (B, clip_embeddings_dim)
       w: (clip_embeddings_dim, tokens * cross_dim)   (x @ w == PyTorch x @ W.T)
       b: (tokens * cross_dim,)
       gamma, beta: (cross_dim,)
       param_dtype: dtype for w/b.  Defaults to bf16 (kernel is W-HBM-bandwidth
                    bound; LayerNorm renormalizes so accuracy impact is small).
                    Use jnp.float32 / None for exact f32 module numerics.
       returns (B, tokens, cross_dim)"""
    B, K = image_embeds.shape
    T = clip_extra_context_tokens
    D = cross_attention_dim
    N = T * D
    assert w.shape == (K, N) and b.shape == (N,)
    assert gamma.shape == (D,) and beta.shape == (D,)

    out_dtype = image_embeds.dtype
    if param_dtype is not None:
        w = w.astype(param_dtype)
        b = b.astype(param_dtype)

    # Pad batch up to the f32 sublane tile -> unmasked sublane stores.
    B_pad = max(_SUBLANE, ((B + _SUBLANE - 1) // _SUBLANE) * _SUBLANE)
    x = image_embeds
    if B_pad != B:
        x = jnp.pad(x, ((0, B_pad - B), (0, 0)))

    b2 = b.reshape(1, N)
    g2 = gamma.reshape(1, D)
    beta2 = beta.reshape(1, D)
    vmem_limit = _vmem_limit_bytes()

    if D % 128 == 0:
        # ---- main path: one token per grid step, sharded across TCs on v7x ----
        out2d = pl.pallas_call(
            _token_kernel,
            out_shape=jax.ShapeDtypeStruct((B_pad, N), out_dtype),
            grid_spec=pltpu.PrefetchScalarGridSpec(
                num_scalar_prefetch=0,
                grid=(T,),
                in_specs=[
                    pl.BlockSpec((B_pad, K), lambda t: (0, 0)),      # x: resident
                    pl.BlockSpec((K, D), lambda t: (0, t),
                                 pipeline_mode=pl.Buffered(2)),      # W: streamed
                    pl.BlockSpec((1, D), lambda t: (0, t)),          # bias slice
                    pl.BlockSpec((1, D), lambda t: (0, 0)),          # gamma
                    pl.BlockSpec((1, D), lambda t: (0, 0)),          # beta
                ],
                out_specs=pl.BlockSpec((B_pad, D), lambda t: (0, t)),
            ),
            compiler_params=pltpu.CompilerParams(
                dimension_semantics=("parallel",),   # independent token blocks
                vmem_limit_bytes=vmem_limit),
        )(x, w, b2, g2, beta2)
    else:
        # ---- fallback: D not a multiple of 128; block shapes == full arrays ----
        kernel = functools.partial(_fused_kernel, tokens=T, cross_dim=D)
        out2d = pl.pallas_call(
            kernel,
            out_shape=jax.ShapeDtypeStruct((B_pad, N), out_dtype),
            grid_spec=pltpu.PrefetchScalarGridSpec(
                num_scalar_prefetch=0,
                grid=(1,),
                in_specs=[
                    pl.BlockSpec((B_pad, K), lambda i: (0, 0)),
                    pl.BlockSpec((K, N), lambda i: (0, 0),
                                 pipeline_mode=pl.Buffered(1)),  # single step: no pipelining
                    pl.BlockSpec((1, N), lambda i: (0, 0)),
                    pl.BlockSpec((1, D), lambda i: (0, 0)),
                    pl.BlockSpec((1, D), lambda i: (0, 0)),
                ],
                out_specs=pl.BlockSpec((B_pad, N), lambda i: (0, 0)),
            ),
            compiler_params=pltpu.CompilerParams(vmem_limit_bytes=vmem_limit),
        )(x, w, b2, g2, beta2)

    # Free wrapper reshape: (B, T*D) -> (B, T, D), identical to PyTorch's
    # .reshape(-1, tokens, cross_dim) applied before LayerNorm.
    return out2d[:B].reshape(B, T, D)


def _reference(image_embeds, w, b, gamma, beta, T, D):
    x = image_embeds.astype(jnp.float32)
    y = jnp.dot(x, w.astype(jnp.float32),
                precision=jax.lax.Precision.HIGHEST) + b.astype(jnp.float32)
    y = y.reshape(-1, T, D)
    mean = jnp.mean(y, axis=-1, keepdims=True)
    var = jnp.mean((y - mean) ** 2, axis=-1, keepdims=True)
    return (y - mean) * jax.lax.rsqrt(var + LN_EPS) * gamma + beta


if __name__ == "__main__":
    # Small shapes consistent with the module's forward:
    #   clip_embeddings_dim=256, cross_attention_dim=128, tokens=4, batch=2
    B = 2
    CLIP_DIM = 256
    CROSS_DIM = 128
    TOKENS = 4

    key = jax.random.PRNGKey(0)
    k_x, k_w, k_b, k_g, k_beta = jax.random.split(key, 5)

    image_embeds = jax.random.normal(k_x, (B, CLIP_DIM), dtype=jnp.float32)
    w = jax.random.normal(k_w, (CLIP_DIM, TOKENS * CROSS_DIM), dtype=jnp.float32) * 0.02
    b = jax.random.normal(k_b, (TOKENS * CROSS_DIM,), dtype=jnp.float32) * 0.01
    gamma = 1.0 + 0.1 * jax.random.normal(k_g, (CROSS_DIM,), dtype=jnp.float32)
    beta = 0.1 * jax.random.normal(k_beta, (CROSS_DIM,), dtype=jnp.float32)

    # 1) f32 params: exact PyTorch-module semantics.
    out_f32 = image_proj_model(
        image_embeds, w, b, gamma, beta,
        clip_extra_context_tokens=TOKENS,
        cross_attention_dim=CROSS_DIM,
        param_dtype=jnp.float32,
    )
    out_f32 = jax.block_until_ready(out_f32)
    ref_f32 = _reference(image_embeds, w, b, gamma, beta, TOKENS, CROSS_DIM)
    assert out_f32.shape == (B, TOKENS, CROSS_DIM), out_f32.shape
    assert jnp.allclose(out_f32, ref_f32, atol=1e-3, rtol=1e-3), \
        "mismatch vs f32 reference"

    # 2) default path: bf16 weights/bias (halves dominant HBM traffic), f32 accumulate.
    out_bf16 = image_proj_model(
        image_embeds, w, b, gamma, beta,
        clip_extra_context_tokens=TOKENS,
        cross_attention_dim=CROSS_DIM,
    )
    out_bf16 = jax.block_until_ready(out_bf16)
    ref_bf16 = _reference(image_embeds, w.astype(jnp.bfloat16), b.astype(jnp.bfloat16),
                          gamma, beta, TOKENS, CROSS_DIM)
    assert out_bf16.shape == (B, TOKENS, CROSS_DIM), out_bf16.shape
    assert jnp.allclose(out_bf16, ref_bf16, atol=1e-2, rtol=1e-2), \
        "mismatch vs bf16-weight reference"

    print("KERNEL_OK")
</pallas_src>

<mosaic_0001>
module attributes {stable_mosaic.version = 11 : i64} {
  func.func @_token_kernel(%arg0: i32, %arg1: memref<8x256xf32, #tpu.memory_space<vmem>>, %arg2: memref<256x128xf32, #tpu.memory_space<vmem>>, %arg3: memref<1x128xf32, #tpu.memory_space<vmem>>, %arg4: memref<1x128xf32, #tpu.memory_space<vmem>>, %arg5: memref<1x128xf32, #tpu.memory_space<vmem>>, %arg6: memref<8x128xf32, #tpu.memory_space<vmem>>) attributes {dimension_semantics = [#tpu.dimension_semantics<parallel>], iteration_bounds = array<i64: 4>, scalar_prefetch = 0 : i64, scratch_operands = 0 : i64, tpu.core_type = #tpu.core_type<tc>, window_params = [{pipeline_mode = #tpu.pipeline_mode<synchronous>, transform_indices = @transform_0, window_bounds = array<i64: 8, 256>}, {pipeline_mode = #tpu.pipeline_mode<double_buffered>, transform_indices = @transform_1, window_bounds = array<i64: 256, 128>}, {transform_indices = @transform_2, window_bounds = array<i64: 1, 128>}, {pipeline_mode = #tpu.pipeline_mode<synchronous>, transform_indices = @transform_3, window_bounds = array<i64: 1, 128>}, {pipeline_mode = #tpu.pipeline_mode<synchronous>, transform_indices = @transform_4, window_bounds = array<i64: 1, 128>}, {transform_indices = @transform_5, window_bounds = array<i64: 8, 128>}]} {
    %c0 = arith.constant 0 : index
    %c0_0 = arith.constant 0 : index
    %0 = vector.load %arg1[%c0, %c0_0] : memref<8x256xf32, #tpu.memory_space<vmem>>, vector<8x256xf32>
    %c0_1 = arith.constant 0 : index
    %c0_2 = arith.constant 0 : index
    %1 = vector.load %arg2[%c0_1, %c0_2] : memref<256x128xf32, #tpu.memory_space<vmem>>, vector<256x128xf32>
    %cst = arith.constant dense<0.000000e+00> : vector<8x128xf32>
    %2 = tpu.matmul %0, %1, %cst {dimension_numbers = #tpu.dot_dimension_numbers<[1], [0], [0], [1], [0, 0, 1, 1], [], []>} : vector<8x256xf32>, vector<256x128xf32>, vector<8x128xf32> -> vector<8x128xf32>
    %c0_3 = arith.constant 0 : index
    %c0_4 = arith.constant 0 : index
    %3 = vector.load %arg3[%c0_3, %c0_4] : memref<1x128xf32, #tpu.memory_space<vmem>>, vector<1x128xf32>
    %4 = vector.broadcast %3 : vector<1x128xf32> to vector<8x128xf32>
    %5 = arith.addf %2, %4 : vector<8x128xf32>
    %c0_5 = arith.constant 0 : index
    %c0_6 = arith.constant 0 : index
    %6 = vector.load %arg4[%c0_5, %c0_6] : memref<1x128xf32, #tpu.memory_space<vmem>>, vector<1x128xf32>
    %c0_7 = arith.constant 0 : index
    %c0_8 = arith.constant 0 : index
    %7 = vector.load %arg5[%c0_7, %c0_8] : memref<1x128xf32, #tpu.memory_space<vmem>>, vector<1x128xf32>
    %cst_9 = arith.constant dense<0.000000e+00> : vector<8xf32>
    %8 = vector.multi_reduction <add>, %5, %cst_9 [1] : vector<8x128xf32> to vector<8xf32>
    %9 = vector.shape_cast %8 : vector<8xf32> to vector<8x1xf32>
    %cst_10 = arith.constant 1.280000e+02 : f32
    %10 = vector.broadcast %cst_10 : f32 to vector<8x1xf32>
    %11 = arith.divf %9, %10 : vector<8x1xf32>
    %12 = vector.broadcast %11 : vector<8x1xf32> to vector<8x128xf32>
    %13 = arith.subf %5, %12 : vector<8x128xf32>
    %14 = arith.mulf %13, %13 : vector<8x128xf32>
    %cst_11 = arith.constant dense<0.000000e+00> : vector<8xf32>
    %15 = vector.multi_reduction <add>, %14, %cst_11 [1] : vector<8x128xf32> to vector<8xf32>
    %16 = vector.shape_cast %15 : vector<8xf32> to vector<8x1xf32>
    %cst_12 = arith.constant 1.280000e+02 : f32
    %17 = vector.broadcast %cst_12 : f32 to vector<8x1xf32>
    %18 = arith.divf %16, %17 : vector<8x1xf32>
    %cst_13 = arith.constant 9.99999974E-6 : f32
    %19 = vector.broadcast %cst_13 : f32 to vector<8x1xf32>
    %20 = arith.addf %18, %19 : vector<8x1xf32>
    %21 = math.rsqrt %20 : vector<8x1xf32>
    %22 = vector.broadcast %21 : vector<8x1xf32> to vector<8x128xf32>
    %23 = arith.mulf %13, %22 : vector<8x128xf32>
    %24 = vector.broadcast %6 : vector<1x128xf32> to vector<8x128xf32>
    %25 = arith.mulf %23, %24 : vector<8x128xf32>
    %26 = vector.broadcast %7 : vector<1x128xf32> to vector<8x128xf32>
    %27 = arith.addf %25, %26 : vector<8x128xf32>
    %c0_14 = arith.constant 0 : index
    %c0_15 = arith.constant 0 : index
    %28 = vector.load %arg6[%c0_14, %c0_15] : memref<8x128xf32, #tpu.memory_space<vmem>>, vector<8x128xf32>
    tpu.vector_store %arg6[%c0_14, %c0_15], %27 {strides = array<i32>} : memref<8x128xf32, #tpu.memory_space<vmem>>, vector<8x128xf32>,
    return
  }
  func.func @transform_0(%arg0: i32) -> (i32, i32) {
    %c0_i32 = arith.constant 0 : i32
    %c0_i32_0 = arith.constant 0 : i32
    %c0_i32_1 = arith.constant 0 : i32
    return %c0_i32, %c0_i32_0 : i32, i32
  }
  func.func @transform_1(%arg0: i32) -> (i32, i32) {
    %c0_i32 = arith.constant 0 : i32
    %c0_i32_0 = arith.constant 0 : i32
    return %c0_i32, %arg0 : i32, i32
  }
  func.func @transform_2(%arg0: i32) -> (i32, i32) {
    %c0_i32 = arith.constant 0 : i32
    %c0_i32_0 = arith.constant 0 : i32
    return %c0_i32, %arg0 : i32, i32
  }
  func.func @transform_3(%arg0: i32) -> (i32, i32) {
    %c0_i32 = arith.constant 0 : i32
    %c0_i32_0 = arith.constant 0 : i32
    %c0_i32_1 = arith.constant 0 : i32
    return %c0_i32, %c0_i32_0 : i32, i32
  }
  func.func @transform_4(%arg0: i32) -> (i32, i32) {
    %c0_i32 = arith.constant 0 : i32
    %c0_i32_0 = arith.constant 0 : i32
    %c0_i32_1 = arith.constant 0 : i32
    return %c0_i32, %c0_i32_0 : i32, i32
  }
  func.func @transform_5(%arg0: i32) -> (i32, i32) {
    %c0_i32 = arith.constant 0 : i32
    %c0_i32_0 = arith.constant 0 : i32
    return %c0_i32, %arg0 : i32, i32
  }
}

</mosaic_0001>

<bundles_post_ra>
// kernel: tpu_custom_call.1
= control target key start
LH: loop header
LB: loop body
LE: loop exit
PB: predicated region body
PF: predicated region fallthrough
CT: control target
= control target key end

     0   :  { %s1098_s0 = inlined_call_operand.hbm [shape: f32[8,256], index: 0, kind: input, shape index: {}]   ;;  %s1099_s1 = inlined_call_operand.hbm [shape: f32[256,512], index: 1, kind: input, shape index: {}]   ;;  %s1100_s2 = inlined_call_operand.hbm [shape: f32[1,512], index: 2, kind: input, shape index: {}]   ;;  %s1101_s3 = inlined_call_operand.vmem [shape: f32[1,128], index: 3, kind: input, shape index: {}]   ;;  %s1102_s4 = inlined_call_operand.vmem [shape: f32[1,128], index: 4, kind: input, shape index: {}]   ;;  %s1103_s5 = inlined_call_operand.hbm [shape: f32[8,512], index: 5, kind: output, shape index: {}]  }
   0x1   :  { %1109 = sst [smem:[#allocation12_spill]] %s1099_s1 }
   0x2   :  { %10 = vsyncpa [#allocation3], 0 }
   0x3   :  { %11 = vsyncpa [#allocation6], 0 }
   0x4   :  { %13 = vsyncpa [#allocation6 + $0x1], 0 }
   0x5   :  { %14 = vsyncpa [#allocation4], 0 }
   0x6   :  { %16 = vsyncpa [#allocation4 + $0x1], 0  ;;  %s848_s18 = smov 0   ;;  %s850_s19 = smov 0  }
   0x7   :  { %s852_s20 = smov 0   ;;  %s854_s21 = smov 0  }
   0x8 LB: > { %s869_s22 = sadd.s32 1, %s809_s21   ;;  %s50_s23 = sadd.s32 1, %s805_s20  ;;  %s809_s21 = sphi %s854_s21, %s1127_s21   ;;  %s805_s20 = sphi %s852_s20, %s1126_s20   ;;  %s801_s19 = sphi %s850_s19, %s1125_s19   ;;  %s797_s18 = sphi %s848_s18, %s1124_s18  }
   0x9   : > { %s47_s24 = ssub.s32 %s809_s21, %s869_s22  ;;  %p57_p0 = scmp.ne.s32.totalorder %s805_s20, %s801_s19 }
   0xa   : > { %p48_p1 = scmp.eq.s32.totalorder %s47_s24, 0  ;;  %p58_p2 = scmp.eq.s32.totalorder %s809_s21, 0 }
   0xb   : > { %p618_p3 = scmp.lt.s32.totalorder %s809_s21, 4  ;;  %s198_s26 = sand.u32 1, %s809_s21  }
   0xc   : > { %s879_s25 = scalar_select %p48_p1, %s805_s20, %s50_s23  }
   0xd   : > { %p59_p4 = por %p58_p2, %p57_p0  ;;  %s200_s27 = sand.u32 1, %s805_s20  }
   0xe   : > { %s543_s28 = sshll.u32 %s200_s27, 8  ;;  %s544_s29 = sshll.u32 %s809_s21, 7 }
   0xf   : > { %s1110_s1 = sld [smem:[#allocation12_spill]]  ;;  %s202_s8 = scalar_lea.vmem [#allocation5], %s543_s28 }
  0x10   : > { %s208_s9 = sshll.u32 %s202_s8, 4  ;;  %p894_p5 = pnand %p618_p3, %p59_p4  ;;  %s898_s9 = int_to_ptr.vmem [resolvable:$true] %s208_s9 }
  0x11   : > { %s900_s11 = scalar_lea.sflag [#allocation6], %s198_s26 }
  0x12   : > { %p661_p7 = pneg %p894_p5 }
  0x15   : > { %s892_s7 = scalar_lea.hbm %s1110_s1, %s544_s29  ;;  %s664_s15 = scalar_lea.hbm %s1110_s1, 16384 }
  0x16   : > { %s659_s12 = scalar_lea.hbm %s892_s7, 4096  ;;  %p665_p10 = scmp.lt.s32.totalorder %s892_s7, %s1110_s1 }
  0x17   : > { %p660_p6 = scmp.ne.s32.totalorder %s892_s7, %s659_s12  ;;  %p666_p11 = scmp.lt.s32.totalorder %s664_s15, %s659_s12 }
  0x19   : > { %p662_p8 = pnand %p661_p7, %p660_p6  ;;  %p667_p12 = por %p666_p11, %p665_p10 }
  0x1b   : > { %p663_p9 = pneg %p662_p8 }
  0x1d   : > { %p668_p13 = pnand %p667_p12, %p663_p9 }
  0x1f   : > { %671 = shalt.err (!%p668_p13)
}
  0x20   : > { %s672_s23 = scalar_lea.vmem %s898_s9, 4096  ;;  %s811_s24 = smov [#allocation5]  }
  0x21   : > { %p673_p1 = scmp.ne.s32.totalorder %s898_s9, %s672_s23  ;;  %s677_s26 = sshll.u32 %s811_s24, 4  ;;  %s678_s26 = int_to_ptr.vmem [resolvable:$false] %s677_s26 }
  0x22   : > { %s679_s28 = scalar_lea.vmem %s678_s26, 8192  ;;  %p680_p4 = scmp.lt.s32.totalorder %s898_s9, %s678_s26 }
  0x23   : > { %p675_p2 = pnand %p673_p1, %p661_p7  ;;  %p681_p6 = scmp.lt.s32.totalorder %s679_s28, %s672_s23 }
  0x25   : > { %p676_p3 = pneg %p675_p2  ;;  %p682_p8 = por %p681_p6, %p680_p4 }
  0x27   : > { %p683_p10 = pnand %p682_p8, %p676_p3 }
  0x29   : > { %686 = shalt.err (!%p683_p10)
}
  0x2a   : > { %s812_s29 = smov 512   ;;  %s813_s30 = smov 128  }
  0x2b   : > { %s814_s6 = smov 8   ;;  %s928_s8 = sadd.s32 4294967295, %s809_s21  }
  0x2c   : > { %609 = dma.hbm_to_vmem [thread:$0]  (!%p894_p5), %s892_s7, 4096, %s898_s9, %s900_s11, %s812_s29, %s813_s30, %s814_s6  }
  0x2d   : > { %s539_s12 = sadd.s32 4294967294, %s809_s21   ;;  %p63_p9 = scmp.ne.s32.totalorder %s801_s19, %s797_s18 }
  0x2e   : > { %p1104_p11 = scmp.eq.s32.totalorder %s928_s8, 0  ;;  %p155_p12 = scmp.eq.s32.totalorder %s928_s8, 3 }
  0x2f   : > { %p161_p13 = scmp.eq.s32.totalorder %s539_s12, 3  ;;  %p540_p1 = scmp.ge.s32.totalorder %s809_s21, 1 }
  0x30   : > { %p938_p2 = por %p1104_p11, %p63_p9  ;;  %p945_p3 = por %p155_p12, %p57_p0 }
  0x31   : > { %p949_p4 = por %p161_p13, %p63_p9  ;;  %p168_p6 = scmp.lt.s32.totalorder %s809_s21, 5 }
  0x32   : > { %s1112_s13 = scalar_select %p938_p2, 1, 0 }
  0x33   : > { %s1113_s7 = scalar_select %p945_p3, 1, 0 }
  0x34   : > { %s1114_s9 = scalar_select %p949_p4, 1, 0 }
  0x35   : > { %p954_p8 = pnand %p540_p1, %p168_p6  ;;  %s815_s15 = smov [#allocation2]  }
  0x36   : > { %s181_s16 = sshll.u32 %s815_s15, 4  ;;  %s545_s17 = sshll.u32 %s809_s21, 4  ;;  %s958_s16 = int_to_ptr.vmem [resolvable:$true] %s181_s16 }
  0x37   : > { %s1115_s14 = scalar_select %p954_p8, 1, 0 }
  0x38   : > { %p602_p0 = pneg %p954_p8  ;;  %s966_s26 = scalar_lea.hbm %s1100_s2, %s545_s17 }
  0x39   : > { %s221_s28 = scalar_lea.vmem [#allocation7], %s200_s27  ;;  %s687_s6 = scalar_lea.hbm %s966_s26, 16 }
  0x3a   : > { %s228_s29 = sshll.u32 %s221_s28, 4  ;;  %p972_p10 = pnand %p602_p0, %p1104_p11  ;;  %s229_s29 = int_to_ptr.vmem [resolvable:$true] %s228_s29 }
  0x3b   : > { %p688_p9 = scmp.ne.s32.totalorder %s966_s26, %s687_s6  ;;  %s692_s17 = scalar_lea.hbm %s1100_s2, 64 }
  0x3c   : > { %s1116_s30 = scalar_select %p972_p10, 1, 0 }
  0x3d   : > { %p690_p12 = pnand %p688_p9, %p661_p7  ;;  %p693_p1 = scmp.lt.s32.totalorder %s966_s26, %s1100_s2 }
  0x3e   : > { %p694_p6 = scmp.lt.s32.totalorder %s692_s17, %s687_s6 }
  0x3f   : > { %p691_p13 = pneg %p690_p12 }
  0x40   : > { %p695_p0 = por %p694_p6, %p693_p1 }
  0x42   : > { %p696_p11 = pnand %p695_p0, %p691_p13 }
  0x44   : > { %699 = shalt.err (!%p696_p11)
}
  0x45   : > { %s700_s27 = scalar_lea.vmem %s229_s29, 16  ;;  %s816_s28 = smov [#allocation7]  }
  0x46   : > { %p701_p4 = scmp.ne.s32.totalorder %s229_s29, %s700_s27  ;;  %s705_s1 = sshll.u32 %s816_s28, 4  ;;  %s706_s1 = int_to_ptr.vmem [resolvable:$false] %s705_s1 }
  0x47   : > { %s707_s12 = scalar_lea.vmem %s706_s1, 32  ;;  %p708_p12 = scmp.lt.s32.totalorder %s229_s29, %s706_s1 }
  0x48   : > { %p703_p3 = pnand %p701_p4, %p661_p7  ;;  %p709_p2 = scmp.lt.s32.totalorder %s707_s12, %s700_s27 }
  0x4a   : > { %p704_p9 = pneg %p703_p3  ;;  %p710_p8 = por %p709_p2, %p708_p12 }
  0x4c   : > { %p711_p10 = pnand %p710_p8, %p704_p9 }
  0x4e   : > { %714 = shalt.err (!%p711_p10)
}
  0x4f   : > { %612 = dma.hbm_to_vmem [thread:$0]  (!%p894_p5), %s966_s26, 16, %s229_s29, %s900_s11  }
  0x50   : > { %p1117_p7 = scmp.ne.s32.totalorder %s1116_s30, 0  ;;  %s726_s6 = scalar_lea.vmem %s958_s16, 256 }
  0x51   : > { %p727_p3 = scmp.ne.s32.totalorder %s958_s16, %s726_s6  ;;  %p734_p1 = scmp.lt.s32.totalorder %s958_s16, %s958_s16 }
  0x52   : > { %p717_p11 = pneg %p1117_p7  ;;  %p735_p2 = scmp.lt.s32.totalorder %s726_s6, %s726_s6 }
  0x54   : > { %p729_p4 = pnand %p727_p3, %p717_p11  ;;  %p736_p8 = por %p735_p2, %p734_p1 }
  0x56   : > { %p730_p13 = pneg %p729_p4 }
  0x58   : > { %p737_p10 = pnand %p736_p8, %p730_p13 }
  0x5a   : > { %740 = shalt.err (!%p737_p10)
}
  0x5b   : > { %605 = dma.hbm_to_vmem [thread:$0]  (!%p1117_p7), %s1098_s0, 256, %s958_s16, [#allocation3]  }
  0x5c   : > { %p1118_p5 = scmp.ne.s32.totalorder %s1115_s14, 0 }
  0x5d   : > { %p1119_p6 = scmp.eq.s32.totalorder (!%p1118_p5), %s928_s8, 0 }
  0x5e   : > { %237 = sbr.rel (%p1118_p5) target bundleno = 656 (0x290), region = 40 }
  0x63   : > { %784 = dma.done.wait (%p1119_p6), [#allocation3], 256   ;;  %p1120_p0 = pmov %p1119_p6 }
  0x64   : > { %s243_s11 = sand.u32 1, %s928_s8   ;;  %s1015_s26 = sand.u32 1, %s801_s19  }
  0x65   : > { %786 = vsyncadd (%p1120_p0), [#allocation3], 4294967040  ;;  %s548_s29 = sshll.u32 %s1015_s26, 8  ;;  %s244_s30 = scalar_lea.sflag [#allocation6], %s243_s11 }
  0x66   : > { %s1018_s15 = scalar_lea.vmem [#allocation5], %s548_s29  ;;  %p1121_p9 = scmp.ne.s32.totalorder %s1112_s13, 0 }
  0x68   : > { %788 = dma.done.wait (%p1121_p9), %s244_s30, 4112  }
  0x69   : > { %790 = vsyncadd (%p1121_p9), %s244_s30, 4294963184  ;;  %v319_v0 = vld [vmem:[%s1018_s15 + $0xf8] sm:$0xff]  ;;  %v318_v2 = vld [vmem:[%s1018_s15 + $0xf0] sm:$0xff]  ;;  %s255_s13 = scalar_lea.vmem [#allocation7], %s1015_s26  ;;  %s549_s14 = sshll.u32 %s1015_s26, 3 }
  0x6a   : > { %v303_v1 = vld [vmem:[%s1018_s15 + $0x78] sm:$0xff]  ;;  %557 = vmatprep.subr.mxu0 %v319_v0  ;;  %v302_v3 = vld [vmem:[%s1018_s15 + $0x70] sm:$0xff]  ;;  %v317_v4 = vld [vmem:[%s1018_s15 + $0xe8] sm:$0xff]  ;;  %s554_s27 = sshll.u32 %s928_s8, 7  ;;  %s285_s28 = scalar_lea.vmem [#allocation8], %s549_s14 }
  0x6b   : > { %558 = vmatpush3.msra.mxu0 %v303_v1  ;;  %v301_v5 = vld [vmem:[%s1018_s15 + $0x68] sm:$0xff]  ;;  %v316_v6 = vld [vmem:[%s1018_s15 + $0xe0] sm:$0xff]  ;;  %v315_v8 = vld [vmem:[%s1018_s15 + $0xd8] sm:$0xff]  ;;  %s440_s12 = sshll.u32 %s285_s28, 4  ;;  %s438_s10 = scalar_lea.hbm %s1103_s5, %s554_s27  ;;  %s441_s12 = int_to_ptr.vmem [resolvable:$true] %s440_s12 }
  0x6c   : > { %559 = vmatprep.subr.mxu0 %v318_v2  ;;  %v300_v7 = vld [vmem:[%s1018_s15 + $0x60] sm:$0xff]  ;;  %v299_v9 = vld [vmem:[%s1018_s15 + $0x58] sm:$0xff]  ;;  %v314_v10 = vld [vmem:[%s1018_s15 + $0xd0] sm:$0xff]  ;;  %s427_s11 = scalar_lea.sflag [#allocation4], %s1015_s26  ;;  %s741_s29 = scalar_lea.vmem %s441_s12, 128 }
  0x6d   : > { %560 = vmatpush3.msra.mxu0 %v302_v3  ;;  %v298_v11 = vld [vmem:[%s1018_s15 + $0x50] sm:$0xff]  ;;  %v313_v12 = vld [vmem:[%s1018_s15 + $0xc8] sm:$0xff]  ;;  %v287_v13 = vld [vmem:[#allocation2 + $0x8] sm:$0xff]  ;;  %p742_p12 = scmp.ne.s32.totalorder %s441_s12, %s741_s29  ;;  %p1122_p7 = scmp.ne.s32.totalorder %s1113_s7, 0 }
  0x6e   : > { %561 = vmatprep.subr.mxu0 %v317_v4  ;;  %v297_v14 = vld [vmem:[%s1018_s15 + $0x48] sm:$0xff]  ;;  %391 = vmatprep.mubr.f32.mxu0 %v287_v13  ;;  %v312_v15 = vld [vmem:[%s1018_s15 + $0xc0] sm:$0xff]  ;;  %v311_v17 = vld [vmem:[%s1018_s15 + $0xb8] sm:$0xff]  ;;  %s817_s30 = smov [#allocation8]  }
  0x6f   : > { %562 = vmatpush3.msra.mxu0 %v301_v5  ;;  %v296_v16 = vld [vmem:[%s1018_s15 + $0x40] sm:$0xff]  ;;  %v295_v18 = vld [vmem:[%s1018_s15 + $0x38] sm:$0xff]  ;;  %v310_v19 = vld [vmem:[%s1018_s15 + $0xb0] sm:$0xff]  ;;  %p743_p11 = pnand %p742_p12, %p1122_p7 }
  0x70   : > { %563 = vmatprep.subr.mxu0 %v316_v6  ;;  %v294_v20 = vld [vmem:[%s1018_s15 + $0x30] sm:$0xff]  ;;  %v309_v21 = vld [vmem:[%s1018_s15 + $0xa8] sm:$0xff]  ;;  %v308_v23 = vld [vmem:[%s1018_s15 + $0xa0] sm:$0xff] }
  0x71   : > { %564 = vmatpush3.msra.mxu0 %v300_v7  ;;  %v293_v22 = vld [vmem:[%s1018_s15 + $0x28] sm:$0xff]  ;;  %v292_v24 = vld [vmem:[%s1018_s15 + $0x20] sm:$0xff]  ;;  %v307_v25 = vld [vmem:[%s1018_s15 + $0x98] sm:$0xff]  ;;  %p744_p3 = pneg %p743_p11 }
  0x72   : > { %565 = vmatprep.subr.mxu0 %v315_v8  ;;  %v291_v26 = vld [vmem:[%s1018_s15 + $0x18] sm:$0xff]  ;;  %v306_v27 = vld [vmem:[%s1018_s15 + $0x90] sm:$0xff]  ;;  %v305_v29 = vld [vmem:[%s1018_s15 + $0x88] sm:$0xff] }
  0x73   : > { %566 = vmatpush3.msra.mxu0 %v299_v9  ;;  %v290_v28 = vld [vmem:[%s1018_s15 + $0x10] sm:$0xff]  ;;  %v289_v30 = vld [vmem:[%s1018_s15 + $0x8] sm:$0xff]  ;;  %v304_v31 = vld [vmem:[%s1018_s15 + $0x80] sm:$0xff] }
  0x74   : > { %567 = vmatprep.subr.mxu0 %v314_v10  ;;  %v288_v32 = vld [vmem:[%s1018_s15] sm:$0xff]  ;;  %v286_v33 = vld [vmem:[#allocation2] sm:$0xff]  ;;  %s745_s15 = sshll.u32 %s817_s30, 4  ;;  %s746_s15 = int_to_ptr.vmem [resolvable:$false] %s745_s15 }
  0x75   : > { %568 = vmatpush3.msra.mxu0 %v298_v11  ;;  %v550_v36 = vld [vmem:[%s255_s13] ss:$0 sm:$0xff]  ;;  %s747_s8 = scalar_lea.vmem %s746_s15, 256  ;;  %p748_p4 = scmp.lt.s32.totalorder %s441_s12, %s746_s15 }
  0x76   : > { %569 = vmatprep.subr.mxu0 %v313_v12  ;;  %v551_v47 = vld [vmem:[%s1101_s3] ss:$0 sm:$0xff]  ;;  %p749_p13 = scmp.lt.s32.totalorder %s747_s8, %s741_s29 }
  0x77   : > { %570 = vmatpush3.msra.mxu0 %v297_v14  ;;  %v552_v49 = vld [vmem:[%s1102_s4] ss:$0 sm:$0xff] }
  0x78   : > { %571 = vmatprep.subr.mxu0 %v312_v15  ;;  %p750_p1 = por %p749_p13, %p748_p4 }
  0x79   : > { %572 = vmatpush3.msra.mxu0 %v296_v16 }
  0x7a   : > { %573 = vmatprep.subr.mxu0 %v311_v17  ;;  %p751_p2 = pnand %p750_p1, %p744_p3 }
  0x7b   : > { %574 = vmatpush3.msra.mxu0 %v295_v18 }
  0x7c   : > { %575 = vmatprep.subr.mxu0 %v310_v19 }
  0x7d   : > { %576 = vmatpush3.msra.mxu0 %v294_v20 }
  0x7e   : > { %577 = vmatprep.subr.mxu0 %v309_v21 }
  0x7f   : > { %578 = vmatpush3.msra.mxu0 %v293_v22 }
  0x80   : > { %579 = vmatprep.subr.mxu0 %v308_v23 }
  0x81   : > { %580 = vmatpush3.msra.mxu0 %v292_v24 }
  0x82   : > { %581 = vmatprep.subr.mxu0 %v307_v25 }
  0x83   : > { %582 = vmatpush3.msra.mxu0 %v291_v26 }
  0x84   : > { %583 = vmatprep.subr.mxu0 %v306_v27 }
  0x85   : > { %584 = vmatpush3.msra.mxu0 %v290_v28 }
  0x86   : > { %585 = vmatprep.subr.mxu0 %v305_v29 }
  0x87   : > { %586 = vmatpush3.msra.mxu0 %v289_v30 }
  0x88   : > { %587 = vmatprep.subr.mxu0 %v304_v31 }
  0x89   : > { %588 = vmatpush3.msra.mxu0 %v288_v32 }
  0x8a   : > { %392 = vmatmul.mubr.f32.vlgmr.msra.gmra.mxu0 %v286_v33 }
 0x14a   : > { %v589_v34 = vpop.f32.mrf.mxu0 }
 0x14c   : > { %v590_v35 = vpop.f32.mrf.mxu0 }
 0x14d   : > { %v591_v37 = vadd.f32 %v590_v35, %v589_v34 }
 0x14f   : > { %v394_v38 = vadd.f32 %v591_v37, %v550_v36 }
 0x151   : > { %399 = vadd.xlane.f32.xlu0 %v394_v38 }
 0x1da   : > { %v400_v39 = vpop.xlane.xlu0 %399 }
 0x1db   : > { %v402_v40 = vmul.f32 0.0078125, %v400_v39 }
 0x1dd   : > { %v403_v41 = vsub.f32 %v394_v38, %v402_v40 }
 0x1df   : > { %v404_v42 = vmul.f32 %v403_v41, %v403_v41 }
 0x1e1   : > { %405 = vadd.xlane.f32.xlu0 %v404_v42 }
 0x26a   : > { %v406_v43 = vpop.xlane.xlu0 %405 }
 0x26b   : > { %v407_v44 = vmul.f32 0.0078125, %v406_v43 }
 0x26d   : > { %v408_v45 = vadd.f32 1e-05, %v407_v44 }
 0x26f   : > { %657 = vrsqrt.f32 %v408_v45 }
 0x27c   : > { %v658_v46 = vpop.eup %657 }
 0x27d   : > { %v410_v48 = vmul.f32 %v658_v46, %v403_v41 }
 0x27f   : > { %v417_v50 = vmul.f32 %v551_v47, %v410_v48 }
 0x281   : > { %v424_v51 = vadd.f32 %v552_v49, %v417_v50 }
 0x283   : > { %425 = vst [vmem:[%s285_s28] sm:$0xff] %v424_v51 }
 0x284   : > { %754 = shalt.err (!%p751_p2)
}
 0x285   : > { %s755_s13 = scalar_lea.hbm %s438_s10, 128  ;;  %s759_s16 = scalar_lea.hbm %s1103_s5, 512 }
 0x286   : > { %p756_p8 = scmp.ne.s32.totalorder %s438_s10, %s755_s13  ;;  %p760_p6 = scmp.lt.s32.totalorder %s438_s10, %s1103_s5 }
 0x287   : > { %p761_p0 = scmp.lt.s32.totalorder %s759_s16, %s755_s13 }
 0x288   : > { %p757_p10 = pnand %p756_p8, %p1122_p7 }
 0x289   : > { %p762_p9 = por %p761_p0, %p760_p6 }
 0x28a   : > { %p758_p5 = pneg %p757_p10 }
 0x28c   : > { %p763_p12 = pnand %p762_p9, %p758_p5 }
 0x28e   : > { %766 = shalt.err (!%p763_p12)
}
 0x28f   : > { %600 = dma.vmem_to_hbm [thread:$0]  (%p1122_p7), %s441_s12, 128, %s438_s10, %s427_s11  }
 0x290 PF: > { %p620_p11 = scmp.ge.s32.totalorder %s809_s21, 2  ;;  %s452_s24 = sand.u32 1, %s797_s18  }
 0x291   : > { %p1123_p3 = scmp.ne.s32.totalorder %s1114_s9, 0  ;;  %s453_s27 = scalar_lea.sflag [#allocation4], %s452_s24 }
 0x293   : > { %p614_p4 = pnand %p620_p11, %p1123_p3 }
 0x295   : > { %p615_p13 = pneg %p614_p4 }
 0x297   : > { %792 = dma.done.wait (%p615_p13), %s453_s27, 128  }
 0x298   : > { %794 = vsyncadd (%p615_p13), %s453_s27, 4294967168  ;;  %p19_p1 = scmp.ge.s32.totalorder %s869_s22, 6   ;;  %s1124_s18 = smov %s801_s19 }
 0x299   : > { %s1125_s19 = smov %s805_s20  ;;  %s1126_s20 = smov %s879_s25 }
 0x29a   : > { %s1127_s21 = smov %s869_s22  ;;  %21 = sbr.rel (!%p19_p1) target bundleno = 8 (0x8), region = 101 }
 0x29f   :  { %458 = vsyncpa [#allocation3], 1 }
 0x2a0   :  { %460 = vsyncpa [#allocation3 + $0x1], 1 }
 0x2a1   :  { %461 = vsyncpa [#allocation6], 1 }
 0x2a2   :  { %463 = vsyncpa [#allocation6 + $0x1], 1 }
 0x2a3   :  { %464 = vsyncpa [#allocation4], 1 }
 0x2a4   :  { %466 = vsyncpa [#allocation4 + $0x1], 1 }

</bundles_post_ra>
